<compile_context>
chip_gen: v7x
topology: tpu7x:2x2x1
jax: 0.10.0
libtpu: 0.0.40
codegen_flags: <defaults>
</compile_context>

<pallas_src>
import functools

import jax
import jax.numpy as jnp
import numpy as np
from jax import lax
from jax.experimental import pallas as pl
from jax.experimental.pallas import tpu as pltpu

_LANE = 128
_RESIDENT_V_MAX = 2048   # above this, the one-hot intermediate / table get big


def _round_up(x: int, m: int) -> int:
    return ((x + m - 1) // m) * m


def _sublane_pack(dtype) -> int:
    """Rows per packed sublane group: 8 (f32), 16 (bf16), 32 (int8/fp8)."""
    return 8 * max(1, 4 // jnp.dtype(dtype).itemsize)


def _vmem_budget_bytes() -> int:
    """Generation-aware per-core VMEM budget (physical capacity - headroom)."""
    try:
        cap = int(pltpu.get_tpu_info().vmem_capacity_bytes)
    except Exception:
        cap = 64 << 20                      # conservative: v7x per-TC VMEM
    return max(32 << 20, cap - (16 << 20))  # leave headroom for compiler scratch


# ---------------------------------------------------------------------------
# Kernels
# ---------------------------------------------------------------------------
def _embed_resident_kernel(ids_ref, table_ref, out_ref):
    """Gather a row tile via (one-hot @ table); table is VMEM-resident (1x copy).

    ids_ref:   (T, 1) int32            -- tile of flattened token indices
    table_ref: (V, E_pad) table dtype  -- full table, memory_space=VMEM
    out_ref:   (T, E_pad) table dtype
    """
    ids = ids_ref[...]                                       # (T, 1)
    T = ids.shape[0]
    V = table_ref.shape[0]
    vocab_iota = lax.broadcasted_iota(jnp.int32, (T, V), 1)
    # One-hot values are exactly 0/1 -> lossless in the table dtype (bf16 ok),
    # feeding the MXU's native low-precision path.
    onehot = (ids == vocab_iota).astype(table_ref.dtype)     # (T, V)
    out_ref[...] = jnp.dot(
        onehot, table_ref[...], preferred_element_type=jnp.float32
    ).astype(out_ref.dtype)


def _embed_stream_kernel(ids_ref, table_ref, out_ref, acc_ref):
    """V-tiled variant: stream (V_TILE, E) table blocks, accumulate in f32.

    Grid = (row_tiles, v_tiles); the V axis is a reduction ("arbitrary").
    """
    k = pl.program_id(1)

    @pl.when(k == 0)
    def _init():
        acc_ref[...] = jnp.zeros_like(acc_ref)

    ids = ids_ref[...]                                       # (T, 1)
    T = ids.shape[0]
    vt = table_ref.shape[0]
    vocab_iota = k * vt + lax.broadcasted_iota(jnp.int32, (T, vt), 1)
    onehot = (ids == vocab_iota).astype(table_ref.dtype)     # (T, V_TILE)
    acc_ref[...] += jnp.dot(
        onehot, table_ref[...], preferred_element_type=jnp.float32
    )

    @pl.when(k == pl.num_programs(1) - 1)
    def _finalize():
        out_ref[...] = acc_ref[...].astype(out_ref.dtype)


# ---------------------------------------------------------------------------
# Wrapper
# ---------------------------------------------------------------------------
@functools.partial(jax.jit, static_argnames=("tile", "v_tile"))
def embedder_forward(x, table, *, tile=1024, v_tile=512):
    """Forward pass of `Embedder` (== nn.Embedding gather).

    x:     integer token ids, any shape (e.g. (B, S)).
    table: (V, E) embedding weights (padding_idx row already zeroed).
    Returns x.shape + (E,) with out[..., :] == table[x[...]] (exact copies).
    """
    orig_shape = x.shape
    V, E = table.shape
    N = int(np.prod(orig_shape))
    table_dtype = table.dtype
    itemsize = jnp.dtype(table_dtype).itemsize

    # Lane-dense embedding dim: pad E to a multiple of 128 so the output store
    # path runs unmasked; padded columns are sliced off at the end.
    E_pad = _round_up(E, _LANE)
    if E_pad != E:
        table = jnp.pad(table, ((0, 0), (0, E_pad - E)))

    pack = _sublane_pack(table_dtype)        # 8 f32 / 16 bf16 / 32 int8

    # Row tiling: big tiles amortize the ~0.35us/step grid overhead, but keep
    # at least 2 grid steps when there is enough work so megacore sharding
    # ("parallel" row axis) can engage on v7x.
    n_ceil = _round_up(N, pack)
    if n_ceil >= 2 * pack:
        tile_eff = min(_round_up(tile, pack), _round_up((n_ceil + 1) // 2, pack))
    else:
        tile_eff = n_ceil
    tile_eff = max(tile_eff, pack)

    vmem_budget = _vmem_budget_bytes()

    def _resident_bytes(t):
        tbl = _round_up(V, pack) * E_pad * itemsize
        return (tbl                                    # resident table (1x)
                + tbl                                  # matmul operand value
                + 2 * t * E_pad * itemsize             # out blocks (2x)
                + 2 * _round_up(t, 8) * _LANE * 4      # ids blocks (2x, lane pad)
                + t * _round_up(V, _LANE) * (4 + itemsize))  # iota + one-hot

    def _stream_bytes(t, vt):
        blk = vt * E_pad * itemsize
        return (2 * blk                                # table blocks (2x)
                + blk                                  # matmul operand value
                + 2 * t * E_pad * itemsize             # out blocks (2x)
                + t * E_pad * 4                        # f32 accumulator
                + 2 * _round_up(t, 8) * _LANE * 4      # ids blocks (2x)
                + t * vt * (4 + itemsize))             # iota + one-hot

    use_resident = (V <= _RESIDENT_V_MAX) and (_resident_bytes(pack) <= vmem_budget)

    if use_resident:
        while _resident_bytes(tile_eff) > vmem_budget and tile_eff > pack:
            tile_eff = max(pack, _round_up(tile_eff // 2, pack))
        footprint = _resident_bytes(tile_eff)
    else:
        v_tile_eff = max(pack, min(_round_up(v_tile, pack), _round_up(V, pack)))
        while _stream_bytes(tile_eff, v_tile_eff) > vmem_budget and tile_eff > pack:
            tile_eff = max(pack, _round_up(tile_eff // 2, pack))
        footprint = _stream_bytes(tile_eff, v_tile_eff)
        V_pad = _round_up(V, v_tile_eff)
        if V_pad != V:                     # zero rows: never matched by any id
            table = jnp.pad(table, ((0, V_pad - V), (0, 0)))

    # Correctly sized request (no double-counted double-buffering), clamped to
    # the generation-aware budget so we never ask for the full physical VMEM.
    vmem_limit = int(min(vmem_budget, max(32 << 20, footprint + (8 << 20))))

    # Flatten + pad indices (padded tail uses index 0; rows sliced off below).
    n_pad = _round_up(N, tile_eff)
    ids = x.reshape(N).astype(jnp.int32)
    if n_pad != N:
        ids = jnp.concatenate([ids, jnp.zeros((n_pad - N,), jnp.int32)])
    ids_2d = ids.reshape(n_pad, 1)

    if use_resident:
        grid = (n_pad // tile_eff,)
        out_flat = pl.pallas_call(
            _embed_resident_kernel,
            out_shape=jax.ShapeDtypeStruct((n_pad, E_pad), table_dtype),
            grid_spec=pltpu.PrefetchScalarGridSpec(
                num_scalar_prefetch=0,
                grid=grid,
                in_specs=[
                    pl.BlockSpec((tile_eff, 1), lambda i: (i, 0)),
                    # Whole table in VMEM, single-buffered: copied in once,
                    # no per-step re-copy and no 2x pipeline buffer.
                    pl.BlockSpec(memory_space=pltpu.MemorySpace.VMEM),
                ],
                out_specs=pl.BlockSpec((tile_eff, E_pad), lambda i: (i, 0)),
            ),
            compiler_params=pltpu.CompilerParams(
                dimension_semantics=("parallel",),
                vmem_limit_bytes=vmem_limit,
            ),
        )(ids_2d, table)
    else:
        grid = (n_pad // tile_eff, V_pad // v_tile_eff)
        out_flat = pl.pallas_call(
            _embed_stream_kernel,
            out_shape=jax.ShapeDtypeStruct((n_pad, E_pad), table_dtype),
            grid_spec=pltpu.PrefetchScalarGridSpec(
                num_scalar_prefetch=0,
                grid=grid,
                in_specs=[
                    pl.BlockSpec((tile_eff, 1), lambda i, k: (i, 0)),
                    pl.BlockSpec((v_tile_eff, E_pad), lambda i, k: (k, 0)),
                ],
                out_specs=pl.BlockSpec((tile_eff, E_pad), lambda i, k: (i, 0)),
                scratch_shapes=[pltpu.VMEM((tile_eff, E_pad), jnp.float32)],
            ),
            compiler_params=pltpu.CompilerParams(
                dimension_semantics=("parallel", "arbitrary"),
                vmem_limit_bytes=vmem_limit,
            ),
        )(ids_2d, table)

    if n_pad != N:
        out_flat = out_flat[:N]
    if E_pad != E:
        out_flat = out_flat[:, :E]
    return out_flat.reshape(orig_shape + (E,))


def init_embedder_params(key, vocab_size, embedding_size, padding_idx,
                         dtype=jnp.float32):
    """nn.Embedding-style init: N(0,1) weights, padding_idx row zeroed."""
    table = jax.random.normal(key, (vocab_size, embedding_size), dtype=dtype)
    return table.at[padding_idx].set(0.0)


if __name__ == "__main__":
    key = jax.random.PRNGKey(0)
    k1, k2, k3, k4, k5, k6 = jax.random.split(key, 6)

    # --- Test 1: small f32 table, E<128 (lane padding), tiny N --------------
    V1, E1, pad1 = 32, 32, 0
    table1 = init_embedder_params(k1, V1, E1, pad1, dtype=jnp.float32)
    x1 = jax.random.randint(k2, (2, 8), 0, V1, dtype=jnp.int32)
    x1 = x1.at[0, 0].set(pad1)              # exercise the zeroed pad row
    out1 = jax.block_until_ready(embedder_forward(x1, table1))
    assert out1.shape == (2, 8, E1)
    np.testing.assert_array_equal(np.asarray(out1), np.asarray(table1[x1]))

    # --- Test 2: bf16 table, resident path, multi-step grid, ragged N -------
    V2, E2, pad2 = 256, 128, 0
    table2 = init_embedder_params(k3, V2, E2, pad2, dtype=jnp.bfloat16)
    x2 = jax.random.randint(k4, (4, 300), 0, V2, dtype=jnp.int32)
    x2 = x2.at[0, 0].set(pad2)
    out2 = jax.block_until_ready(embedder_forward(x2, table2))
    assert out2.shape == (4, 300, E2)
    np.testing.assert_array_equal(
        np.asarray(out2.astype(jnp.float32)),
        np.asarray(table2[x2].astype(jnp.float32)))

    # --- Test 3: larger vocab -> streaming V-tiled reduction path -----------
    V3, E3, pad3 = 4096, 256, 0
    table3 = init_embedder_params(k5, V3, E3, pad3, dtype=jnp.bfloat16)
    x3 = jax.random.randint(k6, (2, 128), 0, V3, dtype=jnp.int32)
    x3 = x3.at[0, 0].set(pad3)
    out3 = jax.block_until_ready(embedder_forward(x3, table3))
    assert out3.shape == (2, 128, E3)
    np.testing.assert_array_equal(
        np.asarray(out3.astype(jnp.float32)),
        np.asarray(table3[x3].astype(jnp.float32)))

    print("KERNEL_OK")
</pallas_src>

<mosaic_0001>
module attributes {stable_mosaic.version = 11 : i64} {
  func.func @_embed_resident_kernel(%arg0: i32, %arg1: memref<8x1xi32, #tpu.memory_space<vmem>>, %arg2: memref<32x128xf32, #tpu.memory_space<vmem>>, %arg3: memref<8x128xf32, #tpu.memory_space<vmem>>) attributes {dimension_semantics = [#tpu.dimension_semantics<parallel>], iteration_bounds = array<i64: 2>, scalar_prefetch = 0 : i64, scratch_operands = 0 : i64, tpu.core_type = #tpu.core_type<tc>, window_params = [{transform_indices = @transform_0, window_bounds = array<i64: 8, 1>}, {pipeline_mode = #tpu.pipeline_mode<synchronous>, transform_indices = @transform_1, window_bounds = array<i64: 32, 128>}, {transform_indices = @transform_2, window_bounds = array<i64: 8, 128>}]} {
    %c0 = arith.constant 0 : index
    %c0_0 = arith.constant 0 : index
    %0 = vector.load %arg1[%c0, %c0_0] : memref<8x1xi32, #tpu.memory_space<vmem>>, vector<8x1xi32>
    %1 = tpu.iota {dimensions = array<i32: 1>} : vector<8x32xi32>
    %2 = vector.broadcast %0 : vector<8x1xi32> to vector<8x32xi32>
    %3 = arith.cmpi eq, %2, %1 : vector<8x32xi32>
    %4 = arith.extui %3 : vector<8x32xi1> to vector<8x32xi32>
    %5 = arith.sitofp %4 : vector<8x32xi32> to vector<8x32xf32>
    %c0_1 = arith.constant 0 : index
    %c0_2 = arith.constant 0 : index
    %6 = vector.load %arg2[%c0_1, %c0_2] : memref<32x128xf32, #tpu.memory_space<vmem>>, vector<32x128xf32>
    %cst = arith.constant dense<0.000000e+00> : vector<8x128xf32>
    %7 = tpu.matmul %5, %6, %cst {dimension_numbers = #tpu.dot_dimension_numbers<[1], [0], [0], [1], [0, 0, 1, 1], [], []>} : vector<8x32xf32>, vector<32x128xf32>, vector<8x128xf32> -> vector<8x128xf32>
    %c0_3 = arith.constant 0 : index
    %c0_4 = arith.constant 0 : index
    %8 = vector.load %arg3[%c0_3, %c0_4] : memref<8x128xf32, #tpu.memory_space<vmem>>, vector<8x128xf32>
    tpu.vector_store %arg3[%c0_3, %c0_4], %7 {strides = array<i32>} : memref<8x128xf32, #tpu.memory_space<vmem>>, vector<8x128xf32>,
    return
  }
  func.func @transform_0(%arg0: i32) -> (i32, i32) {
    %c0_i32 = arith.constant 0 : i32
    %c0_i32_0 = arith.constant 0 : i32
    return %arg0, %c0_i32 : i32, i32
  }
  func.func @transform_1(%arg0: i32) -> (i32, i32) {
    %c0_i32 = arith.constant 0 : i32
    %c0_i32_0 = arith.constant 0 : i32
    %c0_i32_1 = arith.constant 0 : i32
    return %c0_i32, %c0_i32_0 : i32, i32
  }
  func.func @transform_2(%arg0: i32) -> (i32, i32) {
    %c0_i32 = arith.constant 0 : i32
    %c0_i32_0 = arith.constant 0 : i32
    return %arg0, %c0_i32 : i32, i32
  }
}

</mosaic_0001>

<bundles_post_ra>
// kernel: embedder_forward.1
= control target key start
LH: loop header
LB: loop body
LE: loop exit
PB: predicated region body
PF: predicated region fallthrough
CT: control target
= control target key end

     0   :  { %s353_s9 = smov 0   ;;  %s382_s0 = inlined_call_operand.vmem [shape: s32[16,1], index: 0, kind: input, shape index: {}]   ;;  %s383_s1 = inlined_call_operand.vmem [shape: f32[32,128], index: 1, kind: input, shape index: {}]   ;;  %s384_s2 = inlined_call_operand.vmem [shape: f32[16,128], index: 2, kind: output, shape index: {}]  }
   0x1 LB: > { %s280_s10 = sadd.s32 4294967295, %s332_s9   ;;  %p284_p0 = scmp.ge.s32.totalorder %s332_s9, 1  ;;  %s332_s9 = sphi %s353_s9, %s12_s9  }
   0x2   : > { %p111_p1 = scmp.lt.s32.totalorder %s332_s9, 3 }
   0x4   : > { %p112_p2 = pnand %p284_p0, %p111_p1 }
   0x5   : > { %p131_p3 = scmp.lt.s32.totalorder (!%p112_p2), %s280_s10, 1  ;;  %v148_v0 = vld [vmem:[%s383_s1] sm:$0xff] (!%p112_p2)  ;;  %v149_v1 = vld [vmem:[%s383_s1 + $0x8] sm:$0xff] (!%p112_p2)  ;;  %v150_v2 = vld [vmem:[%s383_s1 + $0x10] sm:$0xff] (!%p112_p2)  ;;  %v334_v3 = vmov (!%p112_p2), 0   ;;  %v335_v4 = vmov (!%p112_p2), 0.0|0.0   ;;  %v140_v10 = vlaneseq (!%p112_p2) }
   0x6   : > { %115 = sbr.rel (%p112_p2) target bundleno = 360 (0x168), region = 28  ;;  %325 = vset.pattern.permute.xlu0 (!%p112_p2), %v334_v3  ;;  %307 = vmatprep.subr.bf16.mxu0 (!%p112_p2), %v335_v4  ;;  %v308_v5 = vpack.c.bf16 (!%p112_p2), %v149_v1, %v148_v0  ;;  %v151_v6 = vld [vmem:[%s383_s1 + $0x18] sm:$0xff] (!%p112_p2)  ;;  %vm336_vm0 = vmmov (!%p112_p2), 0   ;;  %v337_v9 = vmov (!%p112_p2), 0.0   ;;  %vm152_vm1 = vcmask (!%p112_p2), 261120  }
   0x7   : > { %v311_v7 = vpack.c.bf16 (!%p112_p2), %v151_v6, %v150_v2  ;;  %304 = vmatprep.mubr.msk.f32.mxu0 (!%p112_p2), %vm336_vm0, %v337_v9  ;;  %v141_v11 = vand.u32 (!%p112_p2), 127, %v140_v10 }
   0x8   : > { %309 = vmatpush3.bf16.msra.mxu0 (!%p112_p2), %v308_v5 }
   0x9   : > { %310 = vmatprep.subr.bf16.mxu0 (!%p112_p2), %v335_v4 }
   0xc   : > { %312 = vmatpush3.bf16.msra.mxu0 (!%p112_p2), %v311_v7 }
   0xd   : > { %s386_s10 = smov (!%p131_p3, %s280_s10), 1 }
   0xe   : > { %s285_s19 = sshll.u32 %s386_s10, 3 }
   0xf   : > { %s134_s22 = scalar_lea.vmem %s382_s0, %s285_s19  ;;  %s138_s25 = scalar_lea.vmem %s384_s2, %s285_s19 }
  0x10   : > { %v139_v8 = vld [vmem:[%s134_s22] sm:$0xff] }
  0x11   : > { %143 = vperm.xlu0 %325, %v139_v8  }
  0x90   : > { %v144_v12 = vpop.permute.xlu0 %143 }
  0x91   : > { %vm145_vm2 = vcmp.eq.s32.totalorder %v144_v12, %v141_v11 }
  0x92   : > { %v287_v13 = vsel %vm145_vm2, 1.0, %v337_v9 }
  0x93   : > { %305 = vmatmul.mubr.msk.f32.vlgmr.msra.gmra.mrb[0].mxu0 %vm152_vm1, %v287_v13 }
 0x166   : > { %v222_v14 = vpop.f32.mrb[0].mxu0 }
 0x167   : > { %226 = vst [vmem:[%s138_s25] sm:$0xff] %v222_v14  ;;  %v306_v15 = vpop.f32.mrb[1].mxu0 }
 0x168 PF: > { %s12_s9 = sadd.s32 1, %s332_s9  }
 0x169   : > { %p9_p4 = scmp.ge.s32.totalorder %s12_s9, 4  }
 0x16b   :  { %11 = sbr.rel (!%p9_p4) target bundleno = 1 (0x1), region = 58 }

</bundles_post_ra>
